<compile_context>
chip_gen: v6e
topology: v6e:2x2x1
jax: 0.10.0
libtpu: 0.0.40
codegen_flags: <defaults>
</compile_context>

<pallas_src>
import jax
import jax.numpy as jnp
from jax import lax
from jax.experimental import pallas as pl
from jax.experimental.pallas import tpu as pltpu


def _round_up(n, m):
    return ((n + m - 1) // m) * m


def _leaky_relu(x, slope=0.2):
    return jnp.where(x > 0, x, slope * x)


# ---------------------------------------------------------------------------
# Kernel
# ---------------------------------------------------------------------------
def discriminator_kernel(x_ref, w1_ref, b1_ref, w2_ref, b2_ref, w3t_ref, b3_ref,
                         o_ref):
    # MXU operands in the weight dtype (bf16); f32 accumulation + f32 epilogue
    # (v5e has no bf16 VPU path).
    mx_dtype = w1_ref.dtype
    x = x_ref[...]
    if x.dtype != mx_dtype:            # no-op when the producer already emits bf16
        x = x.astype(mx_dtype)

    # Layer 1: Linear + LeakyReLU(0.2)   (Dropout is identity at inference)
    h1 = jnp.dot(x, w1_ref[...], preferred_element_type=jnp.float32)
    h1 = _leaky_relu(h1 + b1_ref[...])                 # f32 epilogue

    # Layer 2: Linear + LeakyReLU(0.2)
    h2 = jnp.dot(h1.astype(mx_dtype), w2_ref[...],
                 preferred_element_type=jnp.float32)
    h2 = _leaky_relu(h2 + b2_ref[...])                 # f32 epilogue

    # Layer 3 (logits), transposed: (8, h2p) x (TB, h2p)^T -> (8, TB).
    # Batch lives on the lane axis -> lane-dense, narrow writeback.
    logits_t = lax.dot_general(
        w3t_ref[...], h2.astype(mx_dtype),
        dimension_numbers=(((1,), (1,)), ((), ())),
        preferred_element_type=jnp.float32)
    o_ref[...] = (logits_t + b3_ref[...]).astype(o_ref.dtype)


# ---------------------------------------------------------------------------
# Tile selection
# ---------------------------------------------------------------------------
def _choose_batch_tile(B, tile_b):
    """Pick the batch tile TB (batch sits on the lane axis of the output)."""
    if B <= 256:
        # Single full-array block: no partial-block masking, no padding; at
        # this size the call is launch / weight-DMA bound anyway.
        return B
    # Lane-dense tile: TB is a multiple of 128.  Keep >= 4 grid steps when B
    # allows so dimension_semantics=("parallel",) can shard across v7x's two
    # TensorCores; per-step VMEM (x + out double buffers + f32 intermediates
    # + ~0.4 MiB resident weights) stays well under the 32 MiB scoped default.
    n_lane_tiles = pl.cdiv(B, 128)
    target_steps = min(n_lane_tiles, 4)
    tiles_per_step = max(1, min(tile_b // 128,
                                pl.cdiv(n_lane_tiles, target_steps)))
    return tiles_per_step * 128


# ---------------------------------------------------------------------------
# Wrapper
# ---------------------------------------------------------------------------
def discriminator_forward(x, kparams, out_dims, *, tile_b=1024):
    """x: (B, input_dims), ideally already bf16 (the MXU operand dtype).

    Returns (B, out_dims) float32 logits.
    """
    w1, b1 = kparams["w1"], kparams["b1"]
    w2, b2 = kparams["w2"], kparams["b2"]
    w3t, b3 = kparams["w3t"], kparams["b3"]

    B, d_in = x.shape
    assert d_in == w1.shape[0], "input feature dim mismatch"
    h1p, h2p = w1.shape[1], w2.shape[1]
    out_pad = w3t.shape[0]

    TB = _choose_batch_tile(B, tile_b)
    grid = (pl.cdiv(B, TB),)

    flops = 2 * B * (d_in * h1p + h1p * h2p + h2p * out_pad)
    bytes_accessed = (
        B * d_in * x.dtype.itemsize
        + sum(int(a.size) * a.dtype.itemsize
              for a in (w1, b1, w2, b2, w3t, b3))
        + out_pad * B * 4                    # (8, B) f32 logits
    )

    out_t = pl.pallas_call(
        discriminator_kernel,
        out_shape=jax.ShapeDtypeStruct((out_pad, B), jnp.float32),
        grid_spec=pltpu.PrefetchScalarGridSpec(
            num_scalar_prefetch=0,
            grid=grid,
            in_specs=[
                # Activations: tiled along batch (auto double-buffered);
                # ragged last block handled by Pallas partial-block masking.
                pl.BlockSpec((TB, d_in), lambda i: (i, 0)),
                # Weights / biases: constant block index -> VMEM-resident,
                # DMA'd once and reused across all grid steps.
                pl.BlockSpec((d_in, h1p), lambda i: (0, 0)),
                pl.BlockSpec((1, h1p), lambda i: (0, 0)),
                pl.BlockSpec((h1p, h2p), lambda i: (0, 0)),
                pl.BlockSpec((1, h2p), lambda i: (0, 0)),
                pl.BlockSpec((out_pad, h2p), lambda i: (0, 0)),
                pl.BlockSpec((out_pad, 1), lambda i: (0, 0)),
            ],
            # Transposed logits: batch on the lane axis (lane-dense stores).
            out_specs=pl.BlockSpec((out_pad, TB), lambda i: (0, i)),
        ),
        compiler_params=pltpu.CompilerParams(
            dimension_semantics=("parallel",),
            vmem_limit_bytes=32 << 20,   # fits the v7x 64 MiB physical VMEM
        ),
        cost_estimate=pl.CostEstimate(
            flops=flops, transcendentals=0, bytes_accessed=bytes_accessed),
    )(x, w1, b1, w2, b2, w3t, b3)

    # Drop padded logit rows and put batch back on the leading axis (tiny).
    return out_t[:out_dims, :].T


# ---------------------------------------------------------------------------
# Parameter construction
# ---------------------------------------------------------------------------
def init_params(key, input_dims=64, output_dims=2, hidden_dims=500):
    """Deterministic init mimicking nn.Linear's U(-1/sqrt(fan_in), 1/sqrt(fan_in))."""
    def linear(key, fan_in, fan_out):
        kw, kb = jax.random.split(key)
        bound = 1.0 / jnp.sqrt(float(fan_in))
        w = jax.random.uniform(kw, (fan_in, fan_out), jnp.float32, -bound, bound)
        b = jax.random.uniform(kb, (1, fan_out), jnp.float32, -bound, bound)
        return w, b

    k1, k2, k3 = jax.random.split(key, 3)
    w1, b1 = linear(k1, input_dims, hidden_dims)
    w2, b2 = linear(k2, hidden_dims, hidden_dims // 2)
    w3, b3 = linear(k3, hidden_dims // 2, output_dims)
    return dict(w1=w1, b1=b1, w2=w2, b2=b2, w3=w3, b3=b3)


def prepare_params(params_f32, weight_dtype=jnp.bfloat16):
    """Zero-pad feature dims (hiddens to 128 lanes, logits to 8 sublanes),
    store w3 transposed, and cast weights for the MXU.

    Biases stay f32 (the pointwise epilogue runs in f32).  Zero padding keeps
    the math exact: padded hidden columns stay 0 through bias+LeakyReLU and
    padded weight rows contribute nothing downstream.
    """
    def pad_to(a, rows, cols):
        return jnp.pad(a, ((0, rows - a.shape[0]), (0, cols - a.shape[1])))

    d_in, h1 = params_f32["w1"].shape
    h2 = params_f32["w2"].shape[1]
    d_out = params_f32["w3"].shape[1]
    h1p = _round_up(h1, 128)
    h2p = _round_up(h2, 128)
    d_outp = _round_up(d_out, 8)          # sublane axis of the transposed logits

    kparams = dict(
        w1=pad_to(params_f32["w1"], d_in, h1p).astype(weight_dtype),
        b1=pad_to(params_f32["b1"], 1, h1p).astype(jnp.float32),
        w2=pad_to(params_f32["w2"], h1p, h2p).astype(weight_dtype),
        b2=pad_to(params_f32["b2"], 1, h2p).astype(jnp.float32),
        # Layer 3 stored transposed (out_pad, h2p): kernel emits a lane-dense
        # (out_pad, TB) block with batch on the lane axis.
        w3t=pad_to(params_f32["w3"].T, d_outp, h2p).astype(weight_dtype),
        b3=pad_to(params_f32["b3"].T, d_outp, 1).astype(jnp.float32),
    )
    return kparams, d_out


# ---------------------------------------------------------------------------
# References
# ---------------------------------------------------------------------------
def reference_forward_f32(x, p):
    """Pure-f32 reference: exact PyTorch eval-mode semantics."""
    h1 = _leaky_relu(x @ p["w1"] + p["b1"])
    h2 = _leaky_relu(h1 @ p["w2"] + p["b2"])
    return h2 @ p["w3"] + p["b3"]


def reference_forward_matched(x, kp, out_dims):
    """Plain-XLA reference that mirrors the kernel's bf16/f32 compute path."""
    dt = kp["w1"].dtype
    h1 = _leaky_relu(
        jnp.dot(x.astype(dt), kp["w1"], preferred_element_type=jnp.float32)
        + kp["b1"])
    h2 = _leaky_relu(
        jnp.dot(h1.astype(dt), kp["w2"], preferred_element_type=jnp.float32)
        + kp["b2"])
    logits_t = (jnp.dot(kp["w3t"], h2.astype(dt).T,
                        preferred_element_type=jnp.float32) + kp["b3"])
    return logits_t[:out_dims, :].T


# ---------------------------------------------------------------------------
if __name__ == "__main__":
    key = jax.random.PRNGKey(0)
    k_params, k_x1, k_x2 = jax.random.split(key, 3)

    INPUT_DIMS, OUTPUT_DIMS, HIDDEN_DIMS = 64, 2, 500
    params_f32 = init_params(k_params, INPUT_DIMS, OUTPUT_DIMS, HIDDEN_DIMS)
    kparams, out_dims = prepare_params(params_f32, weight_dtype=jnp.bfloat16)

    # --- small batch: single full-array block ------------------------------
    B1 = 8
    x1_f32 = jax.random.normal(k_x1, (B1, INPUT_DIMS), jnp.float32)
    x1 = x1_f32.astype(jnp.bfloat16)   # producer emits bf16 (MXU operand dtype)

    out1 = jax.block_until_ready(discriminator_forward(x1, kparams, out_dims))
    assert out1.shape == (B1, OUTPUT_DIMS)

    ref1_m = reference_forward_matched(x1, kparams, out_dims)
    assert jnp.allclose(out1, ref1_m, atol=2e-3, rtol=2e-3), "mismatch vs matched ref (B=8)"

    ref1_f32 = reference_forward_f32(x1_f32, params_f32)
    assert jnp.allclose(out1, ref1_f32, atol=5e-2, rtol=5e-2), "mismatch vs f32 ref (B=8)"

    # --- ragged batch: grid of 3 with a partial last block, no jnp.pad -----
    B2 = 300
    x2_f32 = jax.random.normal(k_x2, (B2, INPUT_DIMS), jnp.float32)
    x2 = x2_f32.astype(jnp.bfloat16)

    out2 = jax.block_until_ready(discriminator_forward(x2, kparams, out_dims))
    assert out2.shape == (B2, OUTPUT_DIMS)
    ref2_m = reference_forward_matched(x2, kparams, out_dims)
    assert jnp.allclose(out2, ref2_m, atol=2e-3, rtol=2e-3), "mismatch vs matched ref (B=300)"

    print("KERNEL_OK")
</pallas_src>

<mosaic_0001>
module attributes {stable_mosaic.version = 11 : i64} {
  func.func @discriminator_kernel(%arg0: i32, %arg1: memref<8x64xbf16, #tpu.memory_space<vmem>>, %arg2: memref<64x512xbf16, #tpu.memory_space<vmem>>, %arg3: memref<1x512xf32, #tpu.memory_space<vmem>>, %arg4: memref<512x256xbf16, #tpu.memory_space<vmem>>, %arg5: memref<1x256xf32, #tpu.memory_space<vmem>>, %arg6: memref<8x256xbf16, #tpu.memory_space<vmem>>, %arg7: memref<8x1xf32, #tpu.memory_space<vmem>>, %arg8: memref<8x8xf32, #tpu.memory_space<vmem>>) attributes {dimension_semantics = [#tpu.dimension_semantics<parallel>], iteration_bounds = array<i64: 1>, scalar_prefetch = 0 : i64, scratch_operands = 0 : i64, tpu.core_type = #tpu.core_type<tc>, window_params = [{transform_indices = @transform_0, window_bounds = array<i64: 8, 64>}, {pipeline_mode = #tpu.pipeline_mode<synchronous>, transform_indices = @transform_1, window_bounds = array<i64: 64, 512>}, {pipeline_mode = #tpu.pipeline_mode<synchronous>, transform_indices = @transform_2, window_bounds = array<i64: 1, 512>}, {pipeline_mode = #tpu.pipeline_mode<synchronous>, transform_indices = @transform_3, window_bounds = array<i64: 512, 256>}, {pipeline_mode = #tpu.pipeline_mode<synchronous>, transform_indices = @transform_4, window_bounds = array<i64: 1, 256>}, {pipeline_mode = #tpu.pipeline_mode<synchronous>, transform_indices = @transform_5, window_bounds = array<i64: 8, 256>}, {pipeline_mode = #tpu.pipeline_mode<synchronous>, transform_indices = @transform_6, window_bounds = array<i64: 8, 1>}, {transform_indices = @transform_7, window_bounds = array<i64: 8, 8>}]} {
    %c0 = arith.constant 0 : index
    %c0_0 = arith.constant 0 : index
    %0 = vector.load %arg1[%c0, %c0_0] : memref<8x64xbf16, #tpu.memory_space<vmem>>, vector<8x64xbf16>
    %c0_1 = arith.constant 0 : index
    %c0_2 = arith.constant 0 : index
    %1 = vector.load %arg2[%c0_1, %c0_2] : memref<64x512xbf16, #tpu.memory_space<vmem>>, vector<64x512xbf16>
    %cst = arith.constant dense<0.000000e+00> : vector<8x512xf32>
    %2 = tpu.matmul %0, %1, %cst {dimension_numbers = #tpu.dot_dimension_numbers<[1], [0], [0], [1], [0, 0, 1, 1], [], []>} : vector<8x64xbf16>, vector<64x512xbf16>, vector<8x512xf32> -> vector<8x512xf32>
    %c0_3 = arith.constant 0 : index
    %c0_4 = arith.constant 0 : index
    %3 = vector.load %arg3[%c0_3, %c0_4] : memref<1x512xf32, #tpu.memory_space<vmem>>, vector<1x512xf32>
    %4 = vector.broadcast %3 : vector<1x512xf32> to vector<8x512xf32>
    %5 = arith.addf %2, %4 : vector<8x512xf32>
    %cst_5 = arith.constant 0.000000e+00 : f32
    %6 = vector.broadcast %cst_5 : f32 to vector<8x512xf32>
    %7 = arith.cmpf ogt, %5, %6 : vector<8x512xf32>
    %cst_6 = arith.constant 2.000000e-01 : f32
    %8 = vector.broadcast %cst_6 : f32 to vector<8x512xf32>
    %9 = arith.mulf %8, %5 : vector<8x512xf32>
    %10 = arith.select %7, %5, %9 : vector<8x512xi1>, vector<8x512xf32>
    %11 = arith.truncf %10 : vector<8x512xf32> to vector<8x512xbf16>
    %c0_7 = arith.constant 0 : index
    %c0_8 = arith.constant 0 : index
    %12 = vector.load %arg4[%c0_7, %c0_8] : memref<512x256xbf16, #tpu.memory_space<vmem>>, vector<512x256xbf16>
    %cst_9 = arith.constant dense<0.000000e+00> : vector<8x256xf32>
    %13 = tpu.matmul %11, %12, %cst_9 {dimension_numbers = #tpu.dot_dimension_numbers<[1], [0], [0], [1], [0, 0, 1, 1], [], []>} : vector<8x512xbf16>, vector<512x256xbf16>, vector<8x256xf32> -> vector<8x256xf32>
    %c0_10 = arith.constant 0 : index
    %c0_11 = arith.constant 0 : index
    %14 = vector.load %arg5[%c0_10, %c0_11] : memref<1x256xf32, #tpu.memory_space<vmem>>, vector<1x256xf32>
    %15 = vector.broadcast %14 : vector<1x256xf32> to vector<8x256xf32>
    %16 = arith.addf %13, %15 : vector<8x256xf32>
    %cst_12 = arith.constant 0.000000e+00 : f32
    %17 = vector.broadcast %cst_12 : f32 to vector<8x256xf32>
    %18 = arith.cmpf ogt, %16, %17 : vector<8x256xf32>
    %cst_13 = arith.constant 2.000000e-01 : f32
    %19 = vector.broadcast %cst_13 : f32 to vector<8x256xf32>
    %20 = arith.mulf %19, %16 : vector<8x256xf32>
    %21 = arith.select %18, %16, %20 : vector<8x256xi1>, vector<8x256xf32>
    %c0_14 = arith.constant 0 : index
    %c0_15 = arith.constant 0 : index
    %22 = vector.load %arg6[%c0_14, %c0_15] : memref<8x256xbf16, #tpu.memory_space<vmem>>, vector<8x256xbf16>
    %23 = arith.truncf %21 : vector<8x256xf32> to vector<8x256xbf16>
    %cst_16 = arith.constant dense<0.000000e+00> : vector<8x8xf32>
    %24 = tpu.matmul %22, %23, %cst_16 {dimension_numbers = #tpu.dot_dimension_numbers<[1], [1], [0], [0], [0, 0, 1, 0], [], []>} : vector<8x256xbf16>, vector<8x256xbf16>, vector<8x8xf32> -> vector<8x8xf32>
    %c0_17 = arith.constant 0 : index
    %c0_18 = arith.constant 0 : index
    %25 = vector.load %arg7[%c0_17, %c0_18] : memref<8x1xf32, #tpu.memory_space<vmem>>, vector<8x1xf32>
    %26 = vector.broadcast %25 : vector<8x1xf32> to vector<8x8xf32>
    %27 = arith.addf %24, %26 : vector<8x8xf32>
    %c0_19 = arith.constant 0 : index
    %c0_20 = arith.constant 0 : index
    %28 = vector.load %arg8[%c0_19, %c0_20] : memref<8x8xf32, #tpu.memory_space<vmem>>, vector<8x8xf32>
    tpu.vector_store %arg8[%c0_19, %c0_20], %27 {strides = array<i32>} : memref<8x8xf32, #tpu.memory_space<vmem>>, vector<8x8xf32>,
    return
  }
  func.func @transform_0(%arg0: i32) -> (i32, i32) {
    %c0_i32 = arith.constant 0 : i32
    %c0_i32_0 = arith.constant 0 : i32
    return %arg0, %c0_i32 : i32, i32
  }
  func.func @transform_1(%arg0: i32) -> (i32, i32) {
    %c0_i32 = arith.constant 0 : i32
    %c0_i32_0 = arith.constant 0 : i32
    %c0_i32_1 = arith.constant 0 : i32
    return %c0_i32, %c0_i32_0 : i32, i32
  }
  func.func @transform_2(%arg0: i32) -> (i32, i32) {
    %c0_i32 = arith.constant 0 : i32
    %c0_i32_0 = arith.constant 0 : i32
    %c0_i32_1 = arith.constant 0 : i32
    return %c0_i32, %c0_i32_0 : i32, i32
  }
  func.func @transform_3(%arg0: i32) -> (i32, i32) {
    %c0_i32 = arith.constant 0 : i32
    %c0_i32_0 = arith.constant 0 : i32
    %c0_i32_1 = arith.constant 0 : i32
    return %c0_i32, %c0_i32_0 : i32, i32
  }
  func.func @transform_4(%arg0: i32) -> (i32, i32) {
    %c0_i32 = arith.constant 0 : i32
    %c0_i32_0 = arith.constant 0 : i32
    %c0_i32_1 = arith.constant 0 : i32
    return %c0_i32, %c0_i32_0 : i32, i32
  }
  func.func @transform_5(%arg0: i32) -> (i32, i32) {
    %c0_i32 = arith.constant 0 : i32
    %c0_i32_0 = arith.constant 0 : i32
    %c0_i32_1 = arith.constant 0 : i32
    return %c0_i32, %c0_i32_0 : i32, i32
  }
  func.func @transform_6(%arg0: i32) -> (i32, i32) {
    %c0_i32 = arith.constant 0 : i32
    %c0_i32_0 = arith.constant 0 : i32
    %c0_i32_1 = arith.constant 0 : i32
    return %c0_i32, %c0_i32_0 : i32, i32
  }
  func.func @transform_7(%arg0: i32) -> (i32, i32) {
    %c0_i32 = arith.constant 0 : i32
    %c0_i32_0 = arith.constant 0 : i32
    return %c0_i32, %arg0 : i32, i32
  }
}

</mosaic_0001>

<bundles_post_ra>
// kernel: tpu_custom_call.1
= control target key start
LH: loop header
LB: loop body
LE: loop exit
PB: predicated region body
PF: predicated region fallthrough
CT: control target
= control target key end

     0   :  { %12 = vsyncpa [#allocation3], 0  ;;  %s1221_s0 = inlined_call_operand.vmem [shape: bf16[8,64], index: 0, kind: input, shape index: {}]   ;;  %s1222_s1 = inlined_call_operand.hbm [shape: bf16[64,512], index: 1, kind: input, shape index: {}]   ;;  %s1223_s2 = inlined_call_operand.vmem [shape: f32[1,512], index: 2, kind: input, shape index: {}]   ;;  %s1224_s3 = inlined_call_operand.hbm [shape: bf16[512,256], index: 3, kind: input, shape index: {}]   ;;  %s1225_s4 = inlined_call_operand.hbm [shape: f32[1,256], index: 4, kind: input, shape index: {}]   ;;  %s1226_s5 = inlined_call_operand.vmem [shape: bf16[8,256], index: 5, kind: input, shape index: {}]   ;;  %s1227_s6 = inlined_call_operand.vmem [shape: f32[8,1], index: 6, kind: input, shape index: {}]   ;;  %s1228_s7 = inlined_call_operand.hbm [shape: f32[8,8], index: 7, kind: output, shape index: {}]  }
   0x1   :  { %13 = vsyncpa [#allocation6], 0 }
   0x2   :  { %14 = vsyncpa [#allocation4], 0  ;;  %s1148_s24 = smov [#allocation5]  }
   0x3   :  { %s36_s25 = sshll.u32 %s1148_s24, 4  ;;  %s37_s25 = int_to_ptr.vmem [resolvable:$true] %s36_s25 }
   0x4   :  { %s1070_s26 = scalar_lea.vmem %s37_s25, 8192  ;;  %p1075_p1 = scmp.lt.s32.totalorder %s37_s25, %s37_s25 }
   0x5   :  { %p1071_p0 = scmp.ne.s32.totalorder %s37_s25, %s1070_s26  ;;  %p1076_p2 = scmp.lt.s32.totalorder %s1070_s26, %s1070_s26 }
   0x7   :  { %p1077_p3 = por %p1076_p2, %p1075_p1 }
   0x9   :  { %p1078_p4 = pnand %p1077_p3, %p1071_p0 }
   0xb   :  { %1081 = shalt.err (!%p1078_p4)
}
   0xc   :  { %s1149_s27 = smov 128   ;;  %s1150_s28 = smov 8  }
   0xd   :  { %42 = dma.hbm_to_vmem [thread:$0]  %s1224_s3, 8192, %s37_s25, [#allocation6], %s1149_s27, %s1149_s27, %s1150_s28  }
   0xe   :  { %s1151_s8 = smov [#allocation2]  }
   0xf   :  { %s22_s9 = sshll.u32 %s1151_s8, 4  ;;  %s23_s9 = int_to_ptr.vmem [resolvable:$true] %s22_s9 }
  0x10   :  { %s1090_s10 = scalar_lea.vmem %s23_s9, 2048  ;;  %p1095_p6 = scmp.lt.s32.totalorder %s23_s9, %s23_s9 }
  0x11   :  { %p1091_p5 = scmp.ne.s32.totalorder %s23_s9, %s1090_s10  ;;  %p1096_p7 = scmp.lt.s32.totalorder %s1090_s10, %s1090_s10 }
  0x13   :  { %p1097_p8 = por %p1096_p7, %p1095_p6 }
  0x15   :  { %p1098_p9 = pnand %p1097_p8, %p1091_p5 }
  0x17   :  { %1101 = shalt.err (!%p1098_p9)
}
  0x18   :  { %s1152_s11 = smov 256   ;;  %s1153_s12 = smov 16  }
  0x19   :  { %28 = dma.hbm_to_vmem [thread:$0]  %s1222_s1, 2048, %s23_s9, [#allocation3], %s1152_s11, %s1152_s11, %s1153_s12  }
  0x1a   :  { %s1154_s15 = smov [#allocation7]  }
  0x1b   :  { %s49_s16 = sshll.u32 %s1154_s15, 4  ;;  %s50_s16 = int_to_ptr.vmem [resolvable:$true] %s49_s16 }
  0x1c   :  { %s1110_s3 = scalar_lea.vmem %s50_s16, 32  ;;  %p1115_p11 = scmp.lt.s32.totalorder %s50_s16, %s50_s16 }
  0x1d   :  { %p1111_p10 = scmp.ne.s32.totalorder %s50_s16, %s1110_s3  ;;  %p1116_p12 = scmp.lt.s32.totalorder %s1110_s3, %s1110_s3 }
  0x1f   :  { %p1117_p13 = por %p1116_p12, %p1115_p11 }
  0x21   :  { %p1118_p0 = pnand %p1117_p13, %p1111_p10 }
  0x23   :  { %1121 = shalt.err (!%p1118_p0)
}
  0x24   :  { %52 = dma.hbm_to_vmem [thread:$0]  %s1225_s4, 32, %s50_s16, [#allocation6]  }
  0x25   :  { %1142 = dma.done.wait [#allocation3], 2048  }
  0x26   :  { %1143 = vsyncadd [#allocation3], 4294965248 }
  0x27   :  { %1144 = dma.done.wait [#allocation6], 8224  }
  0x28   :  { %1145 = vsyncadd [#allocation6], 4294959072  ;;  %v1155_v0 = vmov 0   ;;  %v940_v1 = vld [vmem:[#allocation2 + $0x64] ss:$16 sps:$4 sm:$0xff]   ;;  %vm186_vm0 = vcmask 523264  }
  0x29   :  { %222 = vmatprep.mubr.bf16.mxu0 %v1155_v0  ;;  %263 = vmatprep.mubr.bf16.mxu1 %v1155_v0  ;;  %v942_v2 = vld [vmem:[#allocation2 + $0x6c] ss:$16 sps:$4 sm:$0xff]   ;;  %v944_v3 = vld [vmem:[#allocation2 + $0x60] ss:$16 sps:$4 sm:$0xff]   ;;  %v945_v4 = vld [vmem:[#allocation2 + $0x68] ss:$16 sps:$4 sm:$0xff]  }
  0x2a   :  { %939 = vset.pattern.permute.xlu0 %v1155_v0  ;;  %198 = vmatprep.subr.bf16.mxu0 %v940_v1  ;;  %v946_v5 = vld [vmem:[#allocation2 + $0x44] ss:$16 sps:$4 sm:$0xff]   ;;  %v948_v6 = vld [vmem:[#allocation2 + $0x4c] ss:$16 sps:$4 sm:$0xff]   ;;  %v950_v7 = vld [vmem:[#allocation2 + $0x40] ss:$16 sps:$4 sm:$0xff]  }
  0x2b   :  { %239 = vmatprep.subr.bf16.mxu1 %v942_v2  ;;  %199 = vmatpush1.bf16.msra.mxu0 %v944_v3  ;;  %v951_v8 = vld [vmem:[#allocation2 + $0x48] ss:$16 sps:$4 sm:$0xff]   ;;  %v952_v9 = vld [vmem:[#allocation2 + $0x24] ss:$16 sps:$4 sm:$0xff]   ;;  %v954_v10 = vld [vmem:[#allocation2 + $0x2c] ss:$16 sps:$4 sm:$0xff]  }
  0x2c   :  { %240 = vmatpush1.bf16.msra.mxu1 %v945_v4  ;;  %200 = vmatprep.subr.bf16.mxu0 %v946_v5  ;;  %v956_v11 = vld [vmem:[#allocation2 + $0x20] ss:$16 sps:$4 sm:$0xff]   ;;  %v957_v12 = vld [vmem:[#allocation2 + $0x28] ss:$16 sps:$4 sm:$0xff]   ;;  %v958_v13 = vld [vmem:[#allocation2 + $0x4] ss:$16 sps:$4 sm:$0xff]  }
  0x2d   :  { %241 = vmatprep.subr.bf16.mxu1 %v948_v6  ;;  %v960_v14 = vld [vmem:[#allocation2 + $0xc] ss:$16 sps:$4 sm:$0xff]   ;;  %v962_v15 = vld [vmem:[#allocation2] ss:$16 sps:$4 sm:$0xff]   ;;  %v963_v16 = vld [vmem:[#allocation2 + $0x8] ss:$16 sps:$4 sm:$0xff]  }
  0x2e   :  { %v966_v17 = vld [vmem:[#allocation5 + $0x74] ss:$8 sps:$4 sm:$0xff]   ;;  %v67_v19 = vld [vmem:[%s1221_s0] sm:$0xf]  ;;  %v964_v20 = vld [vmem:[#allocation5 + $0x70] ss:$8 sps:$4 sm:$0xff]  }
  0x2f   :  { %201 = vmatpush1.bf16.msra.mxu0 %v950_v7  ;;  %v969_v18 = vld [vmem:[#allocation5 + $0x174] ss:$8 sps:$4 sm:$0xff]   ;;  %v967_v21 = vld [vmem:[#allocation5 + $0x170] ss:$8 sps:$4 sm:$0xff]   ;;  %v972_v22 = vld [vmem:[#allocation5 + $0x64] ss:$8 sps:$4 sm:$0xff]  }
  0x30   :  { %242 = vmatpush1.bf16.msra.mxu1 %v951_v8  ;;  %202 = vmatprep.subr.bf16.mxu0 %v952_v9  ;;  %v975_v23 = vld [vmem:[#allocation5 + $0x164] ss:$8 sps:$4 sm:$0xff]   ;;  %v970_v24 = vld [vmem:[#allocation5 + $0x60] ss:$8 sps:$4 sm:$0xff]   ;;  %v978_v26 = vld [vmem:[#allocation5 + $0x54] ss:$8 sps:$4 sm:$0xff]  }
  0x31   :  { %243 = vmatprep.subr.bf16.mxu1 %v954_v10  ;;  %v973_v25 = vld [vmem:[#allocation5 + $0x160] ss:$8 sps:$4 sm:$0xff]   ;;  %v981_v27 = vld [vmem:[#allocation5 + $0x154] ss:$8 sps:$4 sm:$0xff]   ;;  %v976_v28 = vld [vmem:[#allocation5 + $0x50] ss:$8 sps:$4 sm:$0xff]  }
  0x32   :  { %v979_v29 = vld [vmem:[#allocation5 + $0x150] ss:$8 sps:$4 sm:$0xff]   ;;  %v984_v30 = vld [vmem:[#allocation5 + $0x44] ss:$8 sps:$4 sm:$0xff]   ;;  %v982_v32 = vld [vmem:[#allocation5 + $0x40] ss:$8 sps:$4 sm:$0xff]  }
  0x33   :  { %203 = vmatpush1.bf16.msra.mxu0 %v956_v11  ;;  %v987_v31 = vld [vmem:[#allocation5 + $0x144] ss:$8 sps:$4 sm:$0xff]   ;;  %v985_v33 = vld [vmem:[#allocation5 + $0x140] ss:$8 sps:$4 sm:$0xff]   ;;  %v990_v34 = vld [vmem:[#allocation5 + $0x34] ss:$8 sps:$4 sm:$0xff]  }
  0x34   :  { %244 = vmatpush1.bf16.msra.mxu1 %v957_v12  ;;  %204 = vmatprep.subr.bf16.mxu0 %v958_v13  ;;  %v993_v35 = vld [vmem:[#allocation5 + $0x134] ss:$8 sps:$4 sm:$0xff]   ;;  %v988_v36 = vld [vmem:[#allocation5 + $0x30] ss:$8 sps:$4 sm:$0xff]   ;;  %v996_v38 = vld [vmem:[#allocation5 + $0x24] ss:$8 sps:$4 sm:$0xff]  }
  0x35   :  { %245 = vmatprep.subr.bf16.mxu1 %v960_v14  ;;  %v991_v37 = vld [vmem:[#allocation5 + $0x130] ss:$8 sps:$4 sm:$0xff]   ;;  %v999_v39 = vld [vmem:[#allocation5 + $0x124] ss:$8 sps:$4 sm:$0xff]   ;;  %v994_v40 = vld [vmem:[#allocation5 + $0x20] ss:$8 sps:$4 sm:$0xff]  }
  0x36   :  { %v997_v41 = vld [vmem:[#allocation5 + $0x120] ss:$8 sps:$4 sm:$0xff]   ;;  %v1002_v42 = vld [vmem:[#allocation5 + $0x14] ss:$8 sps:$4 sm:$0xff]   ;;  %v1000_v44 = vld [vmem:[#allocation5 + $0x10] ss:$8 sps:$4 sm:$0xff]  }
  0x37   :  { %205 = vmatpush1.bf16.msra.mxu0 %v962_v15  ;;  %v1005_v43 = vld [vmem:[#allocation5 + $0x114] ss:$8 sps:$4 sm:$0xff]   ;;  %v1003_v45 = vld [vmem:[#allocation5 + $0x110] ss:$8 sps:$4 sm:$0xff]   ;;  %v1008_v46 = vld [vmem:[#allocation5 + $0x4] ss:$8 sps:$4 sm:$0xff]  }
  0x38   :  { %246 = vmatpush1.bf16.msra.mxu1 %v963_v16  ;;  %684 = vmatprep.subr.bf16.mxu0 %v966_v17  ;;  %v1011_v47 = vld [vmem:[#allocation5 + $0x104] ss:$8 sps:$4 sm:$0xff]   ;;  %v1006_v48 = vld [vmem:[#allocation5] ss:$8 sps:$4 sm:$0xff]   ;;  %v1014_v50 = vld [vmem:[#allocation5 + $0xf4] ss:$8 sps:$4 sm:$0xff]  }
  0x39   :  { %725 = vmatprep.subr.bf16.mxu1 %v969_v18  ;;  %v1009_v49 = vld [vmem:[#allocation5 + $0x100] ss:$8 sps:$4 sm:$0xff]   ;;  %v1017_v51 = vld [vmem:[#allocation5 + $0x1f4] ss:$8 sps:$4 sm:$0xff]   ;;  %v1012_v52 = vld [vmem:[#allocation5 + $0xf0] ss:$8 sps:$4 sm:$0xff]   ;;  %v86_v18 = vlaneseq }
  0x3a   :  { %862 = vmatmul.mubr.msk.bf16.vlgmr.msra.gmra.mxu0 %vm186_vm0, %v67_v19  ;;  %v1015_v53 = vld [vmem:[#allocation5 + $0x1f0] ss:$8 sps:$4 sm:$0xff]   ;;  %v1020_v54 = vld [vmem:[#allocation5 + $0xe4] ss:$8 sps:$4 sm:$0xff]   ;;  %v1018_v56 = vld [vmem:[#allocation5 + $0xe0] ss:$8 sps:$4 sm:$0xff]  }
  0x3b   :  { %863 = vmatmul.mubr.msk.bf16.vlgmr.msra.gmra.mxu1 %vm186_vm0, %v67_v19  ;;  %685 = vmatpush1.bf16.msra.mxu0 %v964_v20  ;;  %v1023_v55 = vld [vmem:[#allocation5 + $0x1e4] ss:$8 sps:$4 sm:$0xff]   ;;  %v1021_v57 = vld [vmem:[#allocation5 + $0x1e0] ss:$8 sps:$4 sm:$0xff]   ;;  %v1026_v58 = vld [vmem:[#allocation5 + $0xd4] ss:$8 sps:$4 sm:$0xff]  }
  0x3c   :  { %726 = vmatpush1.bf16.msra.mxu1 %v967_v21  ;;  %686 = vmatprep.subr.bf16.mxu0 %v972_v22  ;;  %v1029_v59 = vld [vmem:[#allocation5 + $0x1d4] ss:$8 sps:$4 sm:$0xff]   ;;  %v1024_v60 = vld [vmem:[#allocation5 + $0xd0] ss:$8 sps:$4 sm:$0xff]   ;;  %v1032_v62 = vld [vmem:[#allocation5 + $0xc4] ss:$8 sps:$4 sm:$0xff]  }
  0x3d   :  { %727 = vmatprep.subr.bf16.mxu1 %v975_v23  ;;  %v1027_v61 = vld [vmem:[#allocation5 + $0x1d0] ss:$8 sps:$4 sm:$0xff]   ;;  %v1035_v63 = vld [vmem:[#allocation5 + $0x1c4] ss:$8 sps:$4 sm:$0xff]   ;;  %v1030_v0 = vld [vmem:[#allocation5 + $0xc0] ss:$8 sps:$4 sm:$0xff]  }
  0x3e   :  { %v1033_v1 = vld [vmem:[#allocation5 + $0x1c0] ss:$8 sps:$4 sm:$0xff]   ;;  %v1038_v2 = vld [vmem:[#allocation5 + $0xb4] ss:$8 sps:$4 sm:$0xff]   ;;  %v1036_v4 = vld [vmem:[#allocation5 + $0xb0] ss:$8 sps:$4 sm:$0xff]  }
  0x3f   :  { %687 = vmatpush1.bf16.msra.mxu0 %v970_v24  ;;  %v1041_v3 = vld [vmem:[#allocation5 + $0x1b4] ss:$8 sps:$4 sm:$0xff]   ;;  %v1039_v5 = vld [vmem:[#allocation5 + $0x1b0] ss:$8 sps:$4 sm:$0xff]   ;;  %v1044_v6 = vld [vmem:[#allocation5 + $0xa4] ss:$8 sps:$4 sm:$0xff]  }
  0x40   :  { %728 = vmatpush1.bf16.msra.mxu1 %v973_v25  ;;  %688 = vmatprep.subr.bf16.mxu0 %v978_v26  ;;  %v1047_v7 = vld [vmem:[#allocation5 + $0x1a4] ss:$8 sps:$4 sm:$0xff]   ;;  %v1042_v8 = vld [vmem:[#allocation5 + $0xa0] ss:$8 sps:$4 sm:$0xff]   ;;  %v1050_v10 = vld [vmem:[#allocation5 + $0x94] ss:$8 sps:$4 sm:$0xff]  }
  0x41   :  { %729 = vmatprep.subr.bf16.mxu1 %v981_v27  ;;  %v1045_v9 = vld [vmem:[#allocation5 + $0x1a0] ss:$8 sps:$4 sm:$0xff]   ;;  %v1053_v11 = vld [vmem:[#allocation5 + $0x194] ss:$8 sps:$4 sm:$0xff]   ;;  %v1048_v12 = vld [vmem:[#allocation5 + $0x90] ss:$8 sps:$4 sm:$0xff]  }
  0x42   :  { %v1051_v13 = vld [vmem:[#allocation5 + $0x190] ss:$8 sps:$4 sm:$0xff]   ;;  %v1054_v14 = vld [vmem:[#allocation5 + $0x80] ss:$8 sps:$4 sm:$0xff]   ;;  %v1056_v15 = vld [vmem:[#allocation5 + $0x84] ss:$8 sps:$4 sm:$0xff]  }
  0x43   :  { %689 = vmatpush1.bf16.msra.mxu0 %v976_v28  ;;  %v1057_v16 = vld [vmem:[#allocation5 + $0x180] ss:$8 sps:$4 sm:$0xff]   ;;  %v1059_v17 = vld [vmem:[#allocation5 + $0x184] ss:$8 sps:$4 sm:$0xff]   ;;  %v87_v19 = vshrl.u32 %v86_v18, 7  ;;  %vm828_vm7 = vcmask 64512  }
  0x44   :  { %730 = vmatpush1.bf16.msra.mxu1 %v979_v29  ;;  %690 = vmatprep.subr.bf16.mxu0 %v984_v30  ;;  %v84_v22 = vld [vmem:[%s1223_s2] sm:$0xf] }
  0x45   :  { %731 = vmatprep.subr.bf16.mxu1 %v987_v31  ;;  %v88_v20 = vsub.s32 0, %v87_v19  ;;  %v96_v21 = vsub.s32 2, %v87_v19  ;;  %v92_v23 = vsub.s32 1, %v87_v19  ;;  %v100_v24 = vsub.s32 3, %v87_v19 }
  0x47   :  { %691 = vmatpush1.bf16.msra.mxu0 %v982_v32  ;;  %v89_v25 = vrot.slane %v84_v22, %v88_v20  ;;  %v97_v26 = vrot.slane %v84_v22, %v96_v21  ;;  %v93_v29 = vrot.slane %v84_v22, %v92_v23  ;;  %v101_v30 = vrot.slane %v84_v22, %v100_v24 }
  0x48   :  { %732 = vmatpush1.bf16.msra.mxu1 %v985_v33  ;;  %692 = vmatprep.subr.bf16.mxu0 %v990_v34 }
  0x49   :  { %733 = vmatprep.subr.bf16.mxu1 %v993_v35 }
  0x4b   :  { %693 = vmatpush1.bf16.msra.mxu0 %v988_v36 }
  0x4c   :  { %734 = vmatpush1.bf16.msra.mxu1 %v991_v37  ;;  %694 = vmatprep.subr.bf16.mxu0 %v996_v38 }
  0x4d   :  { %735 = vmatprep.subr.bf16.mxu1 %v999_v39 }
  0x4f   :  { %695 = vmatpush1.bf16.msra.mxu0 %v994_v40 }
  0x50   :  { %736 = vmatpush1.bf16.msra.mxu1 %v997_v41  ;;  %696 = vmatprep.subr.bf16.mxu0 %v1002_v42 }
  0x51   :  { %737 = vmatprep.subr.bf16.mxu1 %v1005_v43 }
  0x53   :  { %697 = vmatpush1.bf16.msra.mxu0 %v1000_v44 }
  0x54   :  { %738 = vmatpush1.bf16.msra.mxu1 %v1003_v45  ;;  %698 = vmatprep.subr.bf16.mxu0 %v1008_v46 }
  0x55   :  { %739 = vmatprep.subr.bf16.mxu1 %v1011_v47 }
  0x57   :  { %699 = vmatpush1.bf16.msra.mxu0 %v1006_v48 }
  0x58   :  { %740 = vmatpush1.bf16.msra.mxu1 %v1009_v49  ;;  %700 = vmatprep.subr.bf16.mxu0 %v1014_v50 }
  0x59   :  { %741 = vmatprep.subr.bf16.mxu1 %v1017_v51 }
  0x5b   :  { %701 = vmatpush2.bf16.msra.mxu0 %v1012_v52 }
  0x5c   :  { %742 = vmatpush2.bf16.msra.mxu1 %v1015_v53  ;;  %702 = vmatprep.subr.bf16.mxu0 %v1020_v54  ;;  %v772_v53 = vld [vmem:[%s1226_s5] sm:$0xff]  ;;  %s1156_s5 = smov [#allocation8]  }
  0x5d   :  { %743 = vmatprep.subr.bf16.mxu1 %v1023_v55  ;;  %v929_v54 = vcombine.high %v772_v53, %v772_v53  ;;  %v775_v55 = vld [vmem:[%s1227_s6] sm:$0xff]  ;;  %s836_s6 = sshll.u32 %s1156_s5, 4  ;;  %s837_s6 = int_to_ptr.vmem [resolvable:$true] %s836_s6 }
  0x5e   :  { %778 = vperm.xlu0 %939, %v775_v55   ;;  %s1122_s23 = scalar_lea.vmem %s837_s6, 128  ;;  %p1127_p2 = scmp.lt.s32.totalorder %s837_s6, %s837_s6 }
  0x5f   :  { %703 = vmatpush2.bf16.msra.mxu0 %v1018_v56  ;;  %v352_v56 = vld [vmem:[#allocation7] sm:$0x3]  ;;  %p1123_p1 = scmp.ne.s32.totalorder %s837_s6, %s1122_s23  ;;  %p1128_p3 = scmp.lt.s32.totalorder %s1122_s23, %s1122_s23 }
  0x60   :  { %744 = vmatpush2.bf16.msra.mxu1 %v1021_v57  ;;  %704 = vmatprep.subr.bf16.mxu0 %v1026_v58  ;;  %v357_v57 = vrot.slane %v352_v56, %v88_v20  ;;  %v361_v58 = vrot.slane %v352_v56, %v92_v23 }
  0x61   :  { %745 = vmatprep.subr.bf16.mxu1 %v1029_v59  ;;  %p1129_p4 = por %p1128_p3, %p1127_p2 }
  0x63   :  { %705 = vmatpush2.bf16.msra.mxu0 %v1024_v60  ;;  %p1130_p5 = pnand %p1129_p4, %p1123_p1 }
  0x64   :  { %746 = vmatpush2.bf16.msra.mxu1 %v1027_v61  ;;  %706 = vmatprep.subr.bf16.mxu0 %v1032_v62 }
  0x65   :  { %747 = vmatprep.subr.bf16.mxu1 %v1035_v63 }
  0x67   :  { %707 = vmatpush2.bf16.msra.mxu0 %v1030_v0 }
  0x68   :  { %748 = vmatpush2.bf16.msra.mxu1 %v1033_v1  ;;  %708 = vmatprep.subr.bf16.mxu0 %v1038_v2 }
  0x69   :  { %749 = vmatprep.subr.bf16.mxu1 %v1041_v3 }
  0x6b   :  { %709 = vmatpush2.bf16.msra.mxu0 %v1036_v4 }
  0x6c   :  { %750 = vmatpush2.bf16.msra.mxu1 %v1039_v5  ;;  %710 = vmatprep.subr.bf16.mxu0 %v1044_v6 }
  0x6d   :  { %751 = vmatprep.subr.bf16.mxu1 %v1047_v7 }
  0x6f   :  { %711 = vmatpush2.bf16.msra.mxu0 %v1042_v8 }
  0x70   :  { %752 = vmatpush2.bf16.msra.mxu1 %v1045_v9  ;;  %712 = vmatprep.subr.bf16.mxu0 %v1050_v10 }
  0x71   :  { %753 = vmatprep.subr.bf16.mxu1 %v1053_v11 }
  0x73   :  { %713 = vmatpush2.bf16.msra.mxu0 %v1048_v12 }
  0x74   :  { %754 = vmatpush2.bf16.msra.mxu1 %v1051_v13  ;;  %714 = vmatprep.subr.bf16.mxu0 %v1056_v15  ;;  %v928_v13 = vcombine.low %v772_v53, %v772_v53 }
  0x75   :  { %755 = vmatprep.subr.bf16.mxu1 %v1059_v17 }
  0x77   :  { %715 = vmatpush2.bf16.msra.mxu0 %v1054_v14 }
  0x78   :  { %756 = vmatpush2.bf16.msra.mxu1 %v1057_v16 }
  0xd9   :  { %v779_v14 = vpop.permute.xlu0 %778 }
  0xfa   :  { %v224_v27 = vpop.f32.mrf.mxu0 }
  0xfb   :  { %v265_v28 = vpop.f32.mrf.mxu1  ;;  %v225_v31 = vadd.f32 %v224_v27, %v89_v25 }
  0xfc   :  { %v266_v32 = vadd.f32 %v265_v28, %v97_v26  ;;  %v226_v33 = vpop.f32.mrf.mxu0 }
  0xfd   :  { %v267_v34 = vpop.f32.mrf.mxu1  ;;  %v276_v35 = vmul.f32 0.2, %v225_v31  ;;  %vm272_vm1 = vcmp.gt.f32.partialorder %v225_v31, 0.0  ;;  %v227_v37 = vadd.f32 %v226_v33, %v93_v29 }
  0xfe   :  { %v278_v36 = vmul.f32 0.2, %v266_v32  ;;  %v268_v38 = vadd.f32 %v267_v34, %v101_v30  ;;  %v228_v39 = vpop.f32.mrf.mxu0  ;;  %vm274_vm2 = vcmp.gt.f32.partialorder %v266_v32, 0.0 }
  0xff   :  { %v269_v40 = vpop.f32.mrf.mxu1  ;;  %vm273_vm3 = vcmp.gt.f32.partialorder %v227_v37, 0.0  ;;  %v277_v41 = vmul.f32 0.2, %v227_v37  ;;  %v280_v44 = vsel %vm272_vm1, %v225_v31, %v276_v35 }
 0x100   :  { %v229_v42 = vpop.f32.mrf.mxu0  ;;  %vm275_vm4 = vcmp.gt.f32.partialorder %v268_v38, 0.0  ;;  %v279_v45 = vmul.f32 0.2, %v268_v38  ;;  %v282_v46 = vsel %vm274_vm2, %v266_v32, %v278_v36  ;;  %v284_v50 = vpack.c.bf16 %v280_v44, %v280_v44 }
 0x101   :  { %v270_v43 = vpop.f32.mrf.mxu1  ;;  %v281_v47 = vsel %vm273_vm3, %v227_v37, %v277_v41  ;;  %v286_v52 = vpack.c.bf16 %v282_v46, %v282_v46 }
 0x102   :  { %v285_v48 = vpack.c.bf16 %v281_v47, %v281_v47  ;;  %v283_v49 = vsel %vm275_vm4, %v268_v38, %v279_v45 }
 0x103   :  { %v287_v51 = vpack.c.bf16 %v283_v49, %v283_v49 }
 0x104   :  { %716 = vmatprep.mubr.bf16.mxu0 %v285_v48 }
 0x105   :  { %757 = vmatprep.mubr.bf16.mxu1 %v287_v51  ;;  %717 = vmatmul.mubr.bf16.vlgmr.msra.gmra.mxu0 %v284_v50 }
 0x106   :  { %758 = vmatmul.mubr.bf16.vlgmr.msra.gmra.mxu1 %v286_v52  ;;  %820 = vmatprep.mubr.bf16.mxu0 %v929_v54 }
 0x1c5   :  { %v718_v59 = vpop.f32.mrf.mxu0 }
 0x1c6   :  { %v719_v60 = vadd.f32 %v718_v59, %v357_v57  ;;  %v759_v61 = vpop.f32.mrf.mxu1 }
 0x1c7   :  { %v720_v62 = vpop.f32.mrf.mxu0 }
 0x1c8   :  { %v760_v63 = vadd.f32 %v759_v61, %v719_v60  ;;  %v721_v0 = vadd.f32 %v720_v62, %v361_v58  ;;  %v761_v1 = vpop.f32.mrf.mxu1 }
 0x1c9   :  { %v722_v2 = vpop.f32.mrf.mxu0 }
 0x1ca   :  { %vm766_vm5 = vcmp.gt.f32.partialorder %v760_v63, 0.0  ;;  %v768_v3 = vmul.f32 0.2, %v760_v63  ;;  %v762_v4 = vadd.f32 %v761_v1, %v721_v0  ;;  %v763_v5 = vpop.f32.mrf.mxu1 }
 0x1cb   :  { %v723_v6 = vpop.f32.mrf.mxu0 }
 0x1cc   :  { %vm767_vm6 = vcmp.gt.f32.partialorder %v762_v4, 0.0  ;;  %v769_v7 = vmul.f32 0.2, %v762_v4  ;;  %v764_v8 = vpop.f32.mrf.mxu1  ;;  %v770_v9 = vsel %vm766_vm5, %v760_v63, %v768_v3 }
 0x1cd   :  { %v773_v12 = vpack.c.bf16 %v770_v9, %v770_v9 }
 0x1ce   :  { %v771_v10 = vsel %vm767_vm6, %v762_v4, %v769_v7 }
 0x1cf   :  { %v774_v11 = vpack.c.bf16 %v771_v10, %v771_v10 }
 0x1d1   :  { %802 = vmatprep.subr.bf16.mxu0 %v774_v11 }
 0x1d2   :  { %803 = vmatpush1.bf16.xpose.msra.mxu0 %v773_v12 }
 0x1d9   :  { %821 = vmatmul.mubr.bf16.vlgmr.msra.gmra.mxu0 %v928_v13 }
 0x299   :  { %v822_v15 = vpop.f32.mrf.mxu0 }
 0x29a   :  { %v823_v16 = vadd.f32 %v822_v15, %v779_v14 }
 0x29b   :  { %v824_v17 = vpop.f32.mrf.mxu0 }
 0x29c   :  { %829 = vst.msk [vmem:[#allocation8] sm:$0xff] %vm828_vm7, %v823_v16 }
 0x29d   :  { %v825_v18 = vpop.f32.mrf.mxu0 }
 0x29e   :  { %1133 = shalt.err (!%p1130_p5)
}
 0x29f   :  { %839 = dma.vmem_to_hbm [thread:$0]  %s837_s6, 128, %s1228_s7, [#allocation4]   ;;  %v826_v19 = vpop.f32.mrf.mxu0 }
 0x2a0   :  { %1146 = dma.done.wait [#allocation4], 128  }
 0x2a1   :  { %1147 = vsyncadd [#allocation4], 4294967168 }
 0x2a2   :  { %843 = vsyncpa [#allocation3], 1 }
 0x2a3   :  { %844 = vsyncpa [#allocation6], 1 }
 0x2a4   :  { %845 = vsyncpa [#allocation4], 1 }

</bundles_post_ra>
